<compile_context>
chip_gen: v5e
topology: v5e:2x2
jax: 0.10.0
libtpu: 0.0.40
codegen_flags: <defaults>
</compile_context>

<pallas_src>
import jax
import jax.numpy as jnp
from jax import lax
from jax.experimental import pallas as pl
from jax.experimental.pallas import tpu as pltpu


def _round_up(n: int, m: int) -> int:
    return ((n + m - 1) // m) * m


def _round_down_128(n: int) -> int:
    return max(128, (n // 128) * 128)


# -----------------------------------------------------------------------------
# Kernels
# -----------------------------------------------------------------------------
def _mlp2_kernel_resident(x_ref, w1_ref, w2_ref, o_ref):
    # x_ref:  (TB, D)    activation tile (new tile every grid step)
    # w1_ref: (H, D)     fc1 weight, native PyTorch layout, VMEM-resident
    # w2_ref: (H, 1)     fc2 weight, VMEM-resident
    # o_ref:  (1, 1, TB) lane-dense output row for this batch tile
    #
    # fc1: h^T = W1 @ x^T (contract the D axis of both operands) so the batch
    # dimension lands on lanes and everything downstream is lane-dense.
    ht = lax.dot_general(
        w1_ref[...], x_ref[...],
        dimension_numbers=(((1,), (1,)), ((), ())),
        preferred_element_type=jnp.float32,
    )                                                   # (H, TB) f32
    ht = jnp.maximum(ht, 0.0)                           # ReLU (VPU)
    # fc2 (single output feature): broadcast-multiply (VPU) + sublane reduce
    # (XLU) instead of an N=1 MXU matmul.
    logits = jnp.sum(ht * w2_ref[...], axis=0, keepdims=True)      # (1, TB)
    probs = 1.0 / (1.0 + jnp.exp(-logits))              # exp on EUP
    o_ref[...] = probs[None].astype(o_ref.dtype)        # (1, 1, TB)


def _mlp2_kernel_ktiled(x_ref, w1_ref, w2_ref, o_ref, acc_ref):
    # Fallback for W1 too large to stay VMEM-resident: grid=(G, KD), the D axis
    # streamed in TK-sized chunks with an (H, TB) f32 accumulator.
    k = pl.program_id(1)

    @pl.when(k == 0)
    def _():
        acc_ref[...] = jnp.zeros_like(acc_ref)

    acc_ref[...] += lax.dot_general(
        w1_ref[...], x_ref[...],
        dimension_numbers=(((1,), (1,)), ((), ())),
        preferred_element_type=jnp.float32,
    )

    @pl.when(k == pl.num_programs(1) - 1)
    def _():
        ht = jnp.maximum(acc_ref[...], 0.0)
        logits = jnp.sum(ht * w2_ref[...], axis=0, keepdims=True)
        o_ref[...] = (1.0 / (1.0 + jnp.exp(-logits)))[None].astype(o_ref.dtype)


# -----------------------------------------------------------------------------
# Wrapper
# -----------------------------------------------------------------------------
def mlp_classifier2_forward(x, w1, w2, *, use_bf16: bool = False,
                            tile_bytes_target: int = 4 * 1024 * 1024,
                            max_block_b: int = 4096):
    """x: (B, D), w1: (H, D), w2: (1, H) -> (B,) probabilities (f32)."""
    B, D = x.shape
    H, D_w = w1.shape
    assert D_w == D and w2.shape == (1, H)

    if use_bf16:
        # Halves HBM bytes for the dominant x stream and W1's VMEM footprint.
        # (In a real pipeline x/W1 would already be bf16; this cast is a
        # convenience for f32 callers.)  Matmul still accumulates in f32 and
        # all post-matmul math stays f32.
        x = x.astype(jnp.bfloat16)
        w1 = w1.astype(jnp.bfloat16)
    x_it = x.dtype.itemsize
    w_it = w1.dtype.itemsize

    # ---- generation-aware VMEM budget --------------------------------------
    try:
        vmem_cap = int(pltpu.get_tpu_info().vmem_capacity_bytes)
    except Exception:                           # no info available: assume v7x
        vmem_cap = 64 * 1024 * 1024
    vmem_budget = (vmem_cap * 3) // 4           # ~48 MiB v7x, ~96 MiB v5e/v6e
    vmem_ceiling = (vmem_cap * 9) // 10         # never request more than the chip has

    # ---- batch tile: target ~tile_bytes_target of x per grid step ----------
    TB = tile_bytes_target // max(D * x_it, 1)
    TB = _round_down_128(min(max(TB, 128), max_block_b))
    if TB >= B:
        TB = B                                  # single full-batch block

    w2c = w2.reshape(H, 1)                      # (1,H)->(H,1): metadata-only reshape
    slack = 2 * 1024 * 1024

    def resident_bytes(tb):
        return (2 * tb * D * x_it               # x, double-buffered by the pipeline
                + 2 * tb * 4                    # output tiles, double-buffered
                + 2 * H * D * w_it              # w1: resident but pipeline keeps 2 bufs
                + 2 * H * 4                     # w2, ditto
                + H * tb * 4                    # (H, TB) f32 intermediate
                + slack)

    def ktiled_bytes(tb, tk):
        return (2 * tb * tk * x_it
                + 2 * tb * 4
                + 2 * H * tk * w_it
                + 2 * H * 4
                + 2 * H * tb * 4                # accumulator + dot temporary
                + slack)

    # Shrink TB only if VMEM demands it; give up on the resident path at 128.
    while resident_bytes(TB) > vmem_budget and TB > 128:
        TB = _round_down_128(TB // 2)
    resident = resident_bytes(TB) <= vmem_budget

    # ---- pallas_call builders -----------------------------------------------
    def run_resident(xp, tb, g):
        est = resident_bytes(tb)
        vmem_limit = int(min(max(est + (4 << 20), 32 << 20), vmem_ceiling))
        out = pl.pallas_call(
            _mlp2_kernel_resident,
            out_shape=jax.ShapeDtypeStruct((g, 1, tb), jnp.float32),
            grid_spec=pltpu.PrefetchScalarGridSpec(
                num_scalar_prefetch=0,
                grid=(g,),
                in_specs=[
                    pl.BlockSpec((tb, D), lambda i: (i, 0)),   # x: new tile per step
                    pl.BlockSpec((H, D), lambda i: (0, 0)),    # w1: grid-resident
                    pl.BlockSpec((H, 1), lambda i: (0, 0)),    # w2: grid-resident
                ],
                out_specs=pl.BlockSpec((1, 1, tb), lambda i: (i, 0, 0)),
            ),
            compiler_params=pltpu.CompilerParams(
                dimension_semantics=("parallel",),
                vmem_limit_bytes=vmem_limit,
            ),
        )(xp, w1, w2c)
        return out.reshape(g * tb)              # lane-dense rows -> flat (g*tb,)

    def make_run_ktiled():
        # Fallback: stream W1 / x over D with an in-VMEM accumulator.
        nonlocal TB
        TK = tile_bytes_target // max(H * w_it, 1)
        TK = _round_down_128(max(TK, 128))
        TK = min(TK, _round_up(D, 128))
        while ktiled_bytes(TB, TK) > vmem_budget and TK > 128:
            TK = _round_down_128(TK // 2)
        while ktiled_bytes(TB, TK) > vmem_budget and TB > 128:
            TB = _round_down_128(TB // 2)
        Dp = _round_up(D, TK)
        KD = Dp // TK
        # Zero-padding the contraction axis is exact (adds 0 to every dot).  It
        # costs one extra HBM pass, but only on this large-weight fallback path.
        xp_full = jnp.pad(x, ((0, 0), (0, Dp - D))) if Dp != D else x
        w1p = jnp.pad(w1, ((0, 0), (0, Dp - D))) if Dp != D else w1

        def run(xpart, tb, g):
            est = ktiled_bytes(tb, TK)
            vmem_limit = int(min(max(est + (4 << 20), 32 << 20), vmem_ceiling))
            out = pl.pallas_call(
                _mlp2_kernel_ktiled,
                out_shape=jax.ShapeDtypeStruct((g, 1, tb), jnp.float32),
                grid_spec=pltpu.PrefetchScalarGridSpec(
                    num_scalar_prefetch=0,
                    grid=(g, KD),
                    in_specs=[
                        pl.BlockSpec((tb, TK), lambda i, k: (i, k)),
                        pl.BlockSpec((H, TK), lambda i, k: (0, k)),
                        pl.BlockSpec((H, 1), lambda i, k: (0, 0)),
                    ],
                    out_specs=pl.BlockSpec((1, 1, tb), lambda i, k: (i, 0, 0)),
                    scratch_shapes=[pltpu.VMEM((H, tb), jnp.float32)],
                ),
                compiler_params=pltpu.CompilerParams(
                    dimension_semantics=("parallel", "arbitrary"),
                    vmem_limit_bytes=vmem_limit,
                ),
            )(xpart, w1p, w2c)
            return out.reshape(g * tb)

        return xp_full, run

    # ---- main grid + (optional) tail call: no full-x pad, no partial blocks --
    if resident:
        x_full, run = x, run_resident
    else:
        x_full, run = make_run_ktiled()

    B0 = (B // TB) * TB
    pieces = []
    if B0 > 0:
        pieces.append(run(x_full, TB, B0 // TB))
    if B0 < B:
        # Tail of < TB rows: this slice copies at most one tile of HBM traffic,
        # unlike padding/copying the whole of x.
        pieces.append(run(x_full[B0:], B - B0, 1))
    y = pieces[0] if len(pieces) == 1 else jnp.concatenate(pieces)

    return jnp.squeeze(y)                       # torch-style .squeeze()


# -----------------------------------------------------------------------------
# Self-test
# -----------------------------------------------------------------------------
if __name__ == "__main__":
    keys = jax.random.split(jax.random.PRNGKey(0), 6)

    def ref_forward(x, w1, w2):
        return jax.nn.sigmoid(jnp.maximum(x @ w1.T, 0.0) @ w2.T).squeeze()

    # 1) Small shapes consistent with the module: input_dim=32, factor=4 -> H=8.
    B, D, FACTOR = 8, 32, 4
    H = D // FACTOR
    x = jax.random.normal(keys[0], (B, D), dtype=jnp.float32)
    w1 = jax.random.uniform(keys[1], (H, D), dtype=jnp.float32,
                            minval=-1.0 / jnp.sqrt(D), maxval=1.0 / jnp.sqrt(D))
    w2 = jax.random.uniform(keys[2], (1, H), dtype=jnp.float32,
                            minval=-1.0 / jnp.sqrt(H), maxval=1.0 / jnp.sqrt(H))
    y = jax.block_until_ready(mlp_classifier2_forward(x, w1, w2))
    ref = ref_forward(x, w1, w2)
    assert y.shape == (B,), y.shape
    assert jnp.allclose(y, ref, atol=1e-5, rtol=1e-5), float(jnp.max(jnp.abs(y - ref)))

    # 1b) Same shapes through the bf16 streaming path (looser tolerance).
    yb = jax.block_until_ready(mlp_classifier2_forward(x, w1, w2, use_bf16=True))
    assert jnp.allclose(yb, ref, atol=2e-2, rtol=2e-2), float(jnp.max(jnp.abs(yb - ref)))

    # 2) Multi-tile batch that does not divide the tile: exercises the main
    #    grid + tail-call split (no padding of x, no partial blocks).
    B2, D2 = 300, 64
    H2 = D2 // FACTOR
    x2 = jax.random.normal(keys[3], (B2, D2), dtype=jnp.float32)
    w12 = jax.random.uniform(keys[4], (H2, D2), dtype=jnp.float32,
                             minval=-1.0 / jnp.sqrt(D2), maxval=1.0 / jnp.sqrt(D2))
    w22 = jax.random.uniform(keys[5], (1, H2), dtype=jnp.float32,
                             minval=-1.0 / jnp.sqrt(H2), maxval=1.0 / jnp.sqrt(H2))
    y2 = jax.block_until_ready(
        mlp_classifier2_forward(x2, w12, w22, tile_bytes_target=64 * 1024))
    ref2 = ref_forward(x2, w12, w22)
    assert y2.shape == (B2,), y2.shape
    assert jnp.allclose(y2, ref2, atol=1e-3, rtol=1e-3), float(jnp.max(jnp.abs(y2 - ref2)))

    print("KERNEL_OK")
</pallas_src>

<mosaic_0001>
module attributes {stable_mosaic.version = 11 : i64} {
  func.func @_mlp2_kernel_resident(%arg0: i32, %arg1: memref<8x32xf32, #tpu.memory_space<vmem>>, %arg2: memref<8x32xf32, #tpu.memory_space<vmem>>, %arg3: memref<8x1xf32, #tpu.memory_space<vmem>>, %arg4: memref<1x1x8xf32, #tpu.memory_space<vmem>>) attributes {dimension_semantics = [#tpu.dimension_semantics<parallel>], iteration_bounds = array<i64: 1>, scalar_prefetch = 0 : i64, scratch_operands = 0 : i64, tpu.core_type = #tpu.core_type<tc>, window_params = [{transform_indices = @transform_0, window_bounds = array<i64: 8, 32>}, {pipeline_mode = #tpu.pipeline_mode<synchronous>, transform_indices = @transform_1, window_bounds = array<i64: 8, 32>}, {pipeline_mode = #tpu.pipeline_mode<synchronous>, transform_indices = @transform_2, window_bounds = array<i64: 8, 1>}, {transform_indices = @transform_3, window_bounds = array<i64: 1, 1, 8>}]} {
    %c0 = arith.constant 0 : index
    %c0_0 = arith.constant 0 : index
    %0 = vector.load %arg2[%c0, %c0_0] : memref<8x32xf32, #tpu.memory_space<vmem>>, vector<8x32xf32>
    %c0_1 = arith.constant 0 : index
    %c0_2 = arith.constant 0 : index
    %1 = vector.load %arg1[%c0_1, %c0_2] : memref<8x32xf32, #tpu.memory_space<vmem>>, vector<8x32xf32>
    %cst = arith.constant dense<0.000000e+00> : vector<8x8xf32>
    %2 = tpu.matmul %0, %1, %cst {dimension_numbers = #tpu.dot_dimension_numbers<[1], [1], [0], [0], [0, 0, 1, 0], [], []>} : vector<8x32xf32>, vector<8x32xf32>, vector<8x8xf32> -> vector<8x8xf32>
    %cst_3 = arith.constant 0.000000e+00 : f32
    %3 = vector.broadcast %cst_3 : f32 to vector<8x8xf32>
    %4 = arith.maximumf %2, %3 : vector<8x8xf32>
    %c0_4 = arith.constant 0 : index
    %c0_5 = arith.constant 0 : index
    %5 = vector.load %arg3[%c0_4, %c0_5] : memref<8x1xf32, #tpu.memory_space<vmem>>, vector<8x1xf32>
    %6 = vector.broadcast %5 : vector<8x1xf32> to vector<8x8xf32>
    %7 = arith.mulf %4, %6 : vector<8x8xf32>
    %cst_6 = arith.constant dense<0.000000e+00> : vector<8xf32>
    %8 = vector.multi_reduction <add>, %7, %cst_6 [0] : vector<8x8xf32> to vector<8xf32>
    %9 = vector.shape_cast %8 : vector<8xf32> to vector<1x8xf32>
    %cst_7 = arith.constant 0.000000e+00 : f32
    %10 = vector.broadcast %cst_7 : f32 to vector<1x8xf32>
    %11 = arith.subf %10, %9 : vector<1x8xf32>
    %12 = math.exp %11 : vector<1x8xf32>
    %cst_8 = arith.constant 1.000000e+00 : f32
    %13 = vector.broadcast %cst_8 : f32 to vector<1x8xf32>
    %14 = arith.addf %13, %12 : vector<1x8xf32>
    %cst_9 = arith.constant 1.000000e+00 : f32
    %15 = vector.broadcast %cst_9 : f32 to vector<1x8xf32>
    %16 = arith.divf %15, %14 : vector<1x8xf32>
    %17 = vector.shape_cast %16 : vector<1x8xf32> to vector<1x1x8xf32>
    %c0_10 = arith.constant 0 : index
    %c0_11 = arith.constant 0 : index
    %c0_12 = arith.constant 0 : index
    %18 = vector.load %arg4[%c0_10, %c0_11, %c0_12] : memref<1x1x8xf32, #tpu.memory_space<vmem>>, vector<1x1x8xf32>
    tpu.vector_store %arg4[%c0_10, %c0_11, %c0_12], %17 {strides = array<i32>} : memref<1x1x8xf32, #tpu.memory_space<vmem>>, vector<1x1x8xf32>,
    return
  }
  func.func @transform_0(%arg0: i32) -> (i32, i32) {
    %c0_i32 = arith.constant 0 : i32
    %c0_i32_0 = arith.constant 0 : i32
    return %arg0, %c0_i32 : i32, i32
  }
  func.func @transform_1(%arg0: i32) -> (i32, i32) {
    %c0_i32 = arith.constant 0 : i32
    %c0_i32_0 = arith.constant 0 : i32
    %c0_i32_1 = arith.constant 0 : i32
    return %c0_i32, %c0_i32_0 : i32, i32
  }
  func.func @transform_2(%arg0: i32) -> (i32, i32) {
    %c0_i32 = arith.constant 0 : i32
    %c0_i32_0 = arith.constant 0 : i32
    %c0_i32_1 = arith.constant 0 : i32
    return %c0_i32, %c0_i32_0 : i32, i32
  }
  func.func @transform_3(%arg0: i32) -> (i32, i32, i32) {
    %c0_i32 = arith.constant 0 : i32
    %c0_i32_0 = arith.constant 0 : i32
    %c0_i32_1 = arith.constant 0 : i32
    return %arg0, %c0_i32, %c0_i32_0 : i32, i32, i32
  }
}

</mosaic_0001>

<bundles_post_ra>
// kernel: tpu_custom_call.1
= control target key start
LH: loop header
LB: loop body
LE: loop exit
PB: predicated region body
PF: predicated region fallthrough
CT: control target
= control target key end

     0   :  { %8 = vsyncpa [#allocation3], 0  ;;  %s209_s0 = inlined_call_operand.vmem [shape: f32[8,32], index: 0, kind: input, shape index: {}]   ;;  %s210_s1 = inlined_call_operand.hbm [shape: f32[8,32], index: 1, kind: input, shape index: {}]   ;;  %s211_s2 = inlined_call_operand.vmem [shape: f32[8,1], index: 2, kind: input, shape index: {}]   ;;  %s212_s3 = inlined_call_operand.hbm [shape: f32[1,1,8], index: 3, kind: output, shape index: {}]  }
   0x1   :  { %9 = vsyncpa [#allocation4], 0  ;;  %s17_s14 = sshll.u32 %s210_s1, 4  ;;  %s174_s15 = smov [#allocation2]   ;;  %s18_s14 = int_to_ptr.hbm [resolvable:$true] %s17_s14 }
   0x2   :  { %s19_s16 = sshll.u32 %s174_s15, 4  ;;  %s20_s16 = int_to_ptr.vmem [resolvable:$true] %s19_s16 }
   0x3   :  { %22 = dma.hbm_to_vmem [thread:$0]  %s18_s14, 128, %s20_s16, [#allocation3]  }
   0x4   :  { %170 = dma.done.wait [#allocation3], 128  }
   0x5   :  { %171 = vsyncadd [#allocation3], 4294967168  ;;  %v175_v0 = vmov 0   ;;  %vm31_vm0 = vcmask 261120   ;;  %v30_v1 = vld [vmem:[%s209_s0] sm:$0xff]  ;;  %vm66_vm1 = vcmask 64512  }
   0x6   :  { %117 = vset.pattern.permute.xlu0 %v175_v0  ;;  %v59_v2 = vld [vmem:[%s211_s2] sm:$0xff]  ;;  %112 = vmatpush.xpose.msk.msra.mxu0 %vm31_vm0, %v30_v1  ;;  %s176_s0 = smov [#allocation5]   ;;  %s102_s22 = sshll.u32 %s212_s3, 4  ;;  %vm93_vm5 = vcmask 57344   ;;  %s103_s22 = int_to_ptr.hbm [resolvable:$true] %s102_s22 }
   0x7   :  { %v29_v3 = vld [vmem:[#allocation2] sm:$0xff]  ;;  %62 = vperm.xlu0 %117, %v59_v2   ;;  %s100_s1 = sshll.u32 %s176_s0, 4  ;;  %s101_s1 = int_to_ptr.vmem [resolvable:$true] %s100_s1 }
   0x9   :  { %113 = vmatmul.msk.f32.vlgmr.msra.gmra.mxu0 %vm31_vm0, %v29_v3 }
  0x79   :  { %v63_v5 = vpop.permute.xlu0 %62 }
  0x86   :  { %v55_v4 = vpop.f32.mrf.mxu0 }
  0x87   :  { %v58_v6 = vmax.f32 %v55_v4, 0.0 }
  0x89   :  { %v65_v7 = vmul.f32 %v63_v5, %v58_v6 }
  0x8b   :  { %v67_v8 = vsel %vm66_vm1, %v65_v7, 0.0 }
  0x8c   :  { %v68_v9 = vrot.slane %v67_v8, 4 }
  0x8e   :  { %v69_v10 = vadd.f32 %v68_v9, %v67_v8 }
  0x90   :  { %v70_v11 = vrot.slane %v69_v10, 2 }
  0x92   :  { %v71_v12 = vadd.f32 %v70_v11, %v69_v10 }
  0x94   :  { %v72_v13 = vrot.slane %v71_v12, 1 }
  0x96   :  { %v73_v14 = vadd.f32 %v72_v13, %v71_v12 }
  0x98   :  { %v74_v15 = vsub.f32 0.0, %v73_v14 }
  0x9a   :  { %v75_v16 = vmul.f32 1.442695, %v74_v15 }
  0x9c   :  { %118 = vpow2.f32 %v75_v16 }
  0xa2   :  { %v119_v17 = vpop.eup %118 }
  0xa3   :  { %v77_v18 = vadd.f32 1.0, %v119_v17 }
  0xa5   :  { %120 = vrcp.f32 %v77_v18  ;;  %v89_v22 = vand.u32 2147483648, %v77_v18  ;;  %v87_v24 = vand.u32 2147483647, %v77_v18  ;;  %vm83_vm3 = vweird.f32 %v77_v18 }
  0xa7   :  { %v90_v26 = vor.u32 1.1754944e-38, %v89_v22  ;;  %vm88_vm6 = vcmp.eq.f32.partialorder %v87_v24, 8.507059e+37 }
  0xab   :  { %v121_v19 = vpop.eup %120 }
  0xac   :  { %v79_v20 = vmul.f32 %v121_v19, %v77_v18  ;;  %vm84_vm2 = vweird.f32 %v121_v19 }
  0xad   :  { %vm85_vm4 = vmor %vm83_vm3, %vm84_vm2 }
  0xae   :  { %v80_v21 = vsub.f32 1.0, %v79_v20 }
  0xb0   :  { %v81_v23 = vmul.f32 %v121_v19, %v80_v21 }
  0xb2   :  { %v82_v25 = vadd.f32 %v121_v19, %v81_v23 }
  0xb4   :  { %v86_v27 = vsel %vm85_vm4, %v121_v19, %v82_v25 }
  0xb5   :  { %v91_v28 = vsel %vm88_vm6, %v90_v26, %v86_v27 }
  0xb6   :  { %94 = vst.msk [vmem:[#allocation5] sm:$0x1] %vm93_vm5, %v91_v28 }
  0xb7   :  { %105 = dma.vmem_to_hbm [thread:$0]  %s101_s1, 16, %s103_s22, [#allocation4]  }
  0xb8   :  { %172 = dma.done.wait [#allocation4], 16  }
  0xb9   :  { %173 = vsyncadd [#allocation4], 4294967280 }
  0xba   :  { %110 = vsyncpa [#allocation3], 1 }
  0xbb   :  { %111 = vsyncpa [#allocation4], 1 }

</bundles_post_ra>
